<compile_context>
chip_gen: v6e
topology: v6e:2x2x1
jax: 0.10.0
libtpu: 0.0.40
codegen_flags: <defaults>
</compile_context>

<pallas_src>
import jax
import jax.numpy as jnp
from jax.experimental import pallas as pl
from jax.experimental.pallas import tpu as pltpu

IN_FEATURES = 784   # 1 * 28 * 28
HIDDEN = 100
OUT = 10
H_PAD = 128         # hidden padded to full lane width
DEFAULT_TB = 1024   # batch tile (near HBM roofline; ~6.5 MB double-buffered x)


def _round_up(n, m):
    return ((n + m - 1) // m) * m


def mlp_kernel(x_ref, w1_ref, b1_ref, w2_ref, b2_ref, o_ref):
    # x: (TB, 784) f32 | w1: (784, 128) bf16 | b1: (1, 128) f32
    # w2: (128, 10) bf16 | b2: (1, 10) f32   | o: (TB, 10) f32
    x = x_ref[...].astype(jnp.bfloat16)            # cast in-kernel (hidden under DMA)
    h = jnp.dot(x, w1_ref[...], preferred_element_type=jnp.float32)
    h = jnp.maximum(h + b1_ref[...], 0.0)          # bias + ReLU in f32
    y = jnp.dot(h.astype(jnp.bfloat16), w2_ref[...],
                preferred_element_type=jnp.float32)
    o_ref[...] = (y + b2_ref[...]).astype(o_ref.dtype)


def _pick_batch_tile(B):
    """Largest useful batch tile (<= DEFAULT_TB).

    - B <= 512: one full-extent block (block dim == array dim, so no (8,128)
      divisibility issue and no padding).
    - 512 < B <= DEFAULT_TB: split into two tiles so the "parallel" batch axis
      can shard across both TensorCores on v7x (harmless on v5e/v6e).
    - larger: stream DEFAULT_TB rows per grid step (ragged last tile is fine).
    """
    if B <= 512:
        return B
    if B <= DEFAULT_TB:
        return _round_up(pl.cdiv(B, 2), 8)
    return DEFAULT_TB


def ann_forward(x_nchw, w1, b1, w2, b2):
    """Equivalent of ANN.forward: flatten -> Linear(784,100) -> ReLU -> Linear(100,10)."""
    B = x_nchw.shape[0]
    x = x_nchw.reshape(B, -1)                      # torch.flatten(x, 1); no pad/cast pass

    tb = _pick_batch_tile(B)
    grid = (pl.cdiv(B, tb),)                       # ragged last tile: OOB rows discarded

    # Weights are tiny; pad hidden 100 -> 128 once so both MXU operands are
    # lane-dense.  Output dim stays 10 (no 128-wide f32 writeback).
    w1_p = jnp.zeros((IN_FEATURES, H_PAD), jnp.bfloat16).at[:, :HIDDEN].set(
        w1.astype(jnp.bfloat16))
    b1_p = jnp.zeros((1, H_PAD), jnp.float32).at[:, :HIDDEN].set(b1)
    w2_p = jnp.zeros((H_PAD, OUT), jnp.bfloat16).at[:HIDDEN, :].set(
        w2.astype(jnp.bfloat16))
    b2_p = b2.reshape(1, OUT).astype(jnp.float32)

    flops = 2 * B * (IN_FEATURES * H_PAD + H_PAD * OUT)
    bytes_accessed = (B * IN_FEATURES * 4 + w1_p.size * 2 + w2_p.size * 2
                      + b1_p.size * 4 + b2_p.size * 4 + B * OUT * 4)

    out = pl.pallas_call(
        mlp_kernel,
        out_shape=jax.ShapeDtypeStruct((B, OUT), jnp.float32),
        grid_spec=pltpu.PrefetchScalarGridSpec(
            num_scalar_prefetch=0,
            grid=grid,
            in_specs=[
                # x streams per batch tile (double-buffered by Pallas).
                pl.BlockSpec((tb, IN_FEATURES), lambda i: (i, 0)),
                # Weights / biases: grid-invariant -> fetched once, stay resident.
                pl.BlockSpec((IN_FEATURES, H_PAD), lambda i: (0, 0)),
                pl.BlockSpec((1, H_PAD), lambda i: (0, 0)),
                pl.BlockSpec((H_PAD, OUT), lambda i: (0, 0)),
                pl.BlockSpec((1, OUT), lambda i: (0, 0)),
            ],
            out_specs=pl.BlockSpec((tb, OUT), lambda i: (i, 0)),
        ),
        compiler_params=pltpu.CompilerParams(
            dimension_semantics=("parallel",),      # megacore-shard batch on v7x
            vmem_limit_bytes=32 * 1024 * 1024,       # ample headroom (v7x: 64 MiB phys)
        ),
        cost_estimate=pl.CostEstimate(
            flops=flops, transcendentals=0, bytes_accessed=bytes_accessed),
    )(x, w1_p, b1_p, w2_p, b2_p)

    return out


def init_params(key):
    # Mimic nn.Linear default init: uniform(-1/sqrt(fan_in), +1/sqrt(fan_in)).
    # Weights stored (in, out) so the kernel computes x @ W.
    k1, k2, k3, k4 = jax.random.split(key, 4)
    bound1 = 1.0 / jnp.sqrt(784.0)
    bound2 = 1.0 / jnp.sqrt(100.0)
    w1 = jax.random.uniform(k1, (784, 100), jnp.float32, -bound1, bound1)
    b1 = jax.random.uniform(k2, (1, 100), jnp.float32, -bound1, bound1)
    w2 = jax.random.uniform(k3, (100, 10), jnp.float32, -bound2, bound2)
    b2 = jax.random.uniform(k4, (1, 10), jnp.float32, -bound2, bound2)
    return w1, b1, w2, b2


if __name__ == "__main__":
    key = jax.random.PRNGKey(0)
    kx, kp = jax.random.split(key)
    # Small MNIST-like batch: (B=2, C=1, H=28, W=28) -> flatten -> 784 features.
    # NOTE: at B=2 the call is launch/overhead bound; the kernel is tuned for
    # real batches (>=512 rows), where x streaming + DMA efficiency dominate.
    x = jax.random.normal(kx, (2, 1, 28, 28), jnp.float32)
    w1, b1, w2, b2 = init_params(kp)

    fwd = jax.jit(ann_forward)
    out = fwd(x, w1, b1, w2, b2)
    out = jax.block_until_ready(out)

    # Reference with the same bf16 quantization of matmul inputs (f32
    # accumulation), matching the kernel's numerics.
    # TODO(synk): bf16 MXU inputs deviate from the all-f32 PyTorch ANN; use f32
    # matmuls if bit-level parity with the PyTorch model is required.
    xf = x.reshape(2, -1)
    xq = xf.astype(jnp.bfloat16).astype(jnp.float32)
    w1q = w1.astype(jnp.bfloat16).astype(jnp.float32)
    w2q = w2.astype(jnp.bfloat16).astype(jnp.float32)
    h = jnp.maximum(xq @ w1q + b1, 0.0)
    ref = h.astype(jnp.bfloat16).astype(jnp.float32) @ w2q + b2

    assert out.shape == (2, 10)
    assert jnp.allclose(out, ref, atol=2e-2, rtol=2e-2)

    print("KERNEL_OK")
</pallas_src>

<mosaic_0001>
module attributes {stable_mosaic.version = 11 : i64} {
  func.func @mlp_kernel(%arg0: i32, %arg1: memref<2x784xf32, #tpu.memory_space<vmem>>, %arg2: memref<784x128xbf16, #tpu.memory_space<vmem>>, %arg3: memref<1x128xf32, #tpu.memory_space<vmem>>, %arg4: memref<128x10xbf16, #tpu.memory_space<vmem>>, %arg5: memref<1x10xf32, #tpu.memory_space<vmem>>, %arg6: memref<2x10xf32, #tpu.memory_space<vmem>>) attributes {dimension_semantics = [#tpu.dimension_semantics<parallel>], iteration_bounds = array<i64: 1>, scalar_prefetch = 0 : i64, scratch_operands = 0 : i64, tpu.core_type = #tpu.core_type<tc>, window_params = [{transform_indices = @transform_0, window_bounds = array<i64: 2, 784>}, {pipeline_mode = #tpu.pipeline_mode<synchronous>, transform_indices = @transform_1, window_bounds = array<i64: 784, 128>}, {pipeline_mode = #tpu.pipeline_mode<synchronous>, transform_indices = @transform_2, window_bounds = array<i64: 1, 128>}, {pipeline_mode = #tpu.pipeline_mode<synchronous>, transform_indices = @transform_3, window_bounds = array<i64: 128, 10>}, {pipeline_mode = #tpu.pipeline_mode<synchronous>, transform_indices = @transform_4, window_bounds = array<i64: 1, 10>}, {transform_indices = @transform_5, window_bounds = array<i64: 2, 10>}]} {
    %c0 = arith.constant 0 : index
    %c0_0 = arith.constant 0 : index
    %0 = vector.load %arg1[%c0, %c0_0] : memref<2x784xf32, #tpu.memory_space<vmem>>, vector<2x784xf32>
    %1 = arith.truncf %0 : vector<2x784xf32> to vector<2x784xbf16>
    %c0_1 = arith.constant 0 : index
    %c0_2 = arith.constant 0 : index
    %2 = vector.load %arg2[%c0_1, %c0_2] : memref<784x128xbf16, #tpu.memory_space<vmem>>, vector<784x128xbf16>
    %cst = arith.constant dense<0.000000e+00> : vector<2x128xf32>
    %3 = tpu.matmul %1, %2, %cst {dimension_numbers = #tpu.dot_dimension_numbers<[1], [0], [0], [1], [0, 0, 1, 1], [], []>} : vector<2x784xbf16>, vector<784x128xbf16>, vector<2x128xf32> -> vector<2x128xf32>
    %c0_3 = arith.constant 0 : index
    %c0_4 = arith.constant 0 : index
    %4 = vector.load %arg3[%c0_3, %c0_4] : memref<1x128xf32, #tpu.memory_space<vmem>>, vector<1x128xf32>
    %5 = vector.broadcast %4 : vector<1x128xf32> to vector<2x128xf32>
    %6 = arith.addf %3, %5 : vector<2x128xf32>
    %cst_5 = arith.constant 0.000000e+00 : f32
    %7 = vector.broadcast %cst_5 : f32 to vector<2x128xf32>
    %8 = arith.maximumf %6, %7 : vector<2x128xf32>
    %9 = arith.truncf %8 : vector<2x128xf32> to vector<2x128xbf16>
    %c0_6 = arith.constant 0 : index
    %c0_7 = arith.constant 0 : index
    %10 = vector.load %arg4[%c0_6, %c0_7] : memref<128x10xbf16, #tpu.memory_space<vmem>>, vector<128x10xbf16>
    %cst_8 = arith.constant dense<0.000000e+00> : vector<2x10xf32>
    %11 = tpu.matmul %9, %10, %cst_8 {dimension_numbers = #tpu.dot_dimension_numbers<[1], [0], [0], [1], [0, 0, 1, 1], [], []>} : vector<2x128xbf16>, vector<128x10xbf16>, vector<2x10xf32> -> vector<2x10xf32>
    %c0_9 = arith.constant 0 : index
    %c0_10 = arith.constant 0 : index
    %12 = vector.load %arg5[%c0_9, %c0_10] : memref<1x10xf32, #tpu.memory_space<vmem>>, vector<1x10xf32>
    %13 = vector.broadcast %12 : vector<1x10xf32> to vector<2x10xf32>
    %14 = arith.addf %11, %13 : vector<2x10xf32>
    %c0_11 = arith.constant 0 : index
    %c0_12 = arith.constant 0 : index
    %15 = vector.load %arg6[%c0_11, %c0_12] : memref<2x10xf32, #tpu.memory_space<vmem>>, vector<2x10xf32>
    tpu.vector_store %arg6[%c0_11, %c0_12], %14 {strides = array<i32>} : memref<2x10xf32, #tpu.memory_space<vmem>>, vector<2x10xf32>,
    return
  }
  func.func @transform_0(%arg0: i32) -> (i32, i32) {
    %c0_i32 = arith.constant 0 : i32
    %c0_i32_0 = arith.constant 0 : i32
    return %arg0, %c0_i32 : i32, i32
  }
  func.func @transform_1(%arg0: i32) -> (i32, i32) {
    %c0_i32 = arith.constant 0 : i32
    %c0_i32_0 = arith.constant 0 : i32
    %c0_i32_1 = arith.constant 0 : i32
    return %c0_i32, %c0_i32_0 : i32, i32
  }
  func.func @transform_2(%arg0: i32) -> (i32, i32) {
    %c0_i32 = arith.constant 0 : i32
    %c0_i32_0 = arith.constant 0 : i32
    %c0_i32_1 = arith.constant 0 : i32
    return %c0_i32, %c0_i32_0 : i32, i32
  }
  func.func @transform_3(%arg0: i32) -> (i32, i32) {
    %c0_i32 = arith.constant 0 : i32
    %c0_i32_0 = arith.constant 0 : i32
    %c0_i32_1 = arith.constant 0 : i32
    return %c0_i32, %c0_i32_0 : i32, i32
  }
  func.func @transform_4(%arg0: i32) -> (i32, i32) {
    %c0_i32 = arith.constant 0 : i32
    %c0_i32_0 = arith.constant 0 : i32
    %c0_i32_1 = arith.constant 0 : i32
    return %c0_i32, %c0_i32_0 : i32, i32
  }
  func.func @transform_5(%arg0: i32) -> (i32, i32) {
    %c0_i32 = arith.constant 0 : i32
    %c0_i32_0 = arith.constant 0 : i32
    return %arg0, %c0_i32 : i32, i32
  }
}

</mosaic_0001>

<bundles_post_ra>
// kernel: ann_forward.1
= control target key start
LH: loop header
LB: loop body
LE: loop exit
PB: predicated region body
PF: predicated region fallthrough
CT: control target
= control target key end

     0   :  { %v30_v27 = vlaneseq  ;;  %v1013_v35 = vmov 1983009808   ;;  %v1014_v40 = vmov 0.0   ;;  %vm1015_vm0 = vmmov 0   ;;  %s1247_s0 = inlined_call_operand.vmem [shape: f32[2,784], index: 0, kind: input, shape index: {}]   ;;  %s1248_s1 = inlined_call_operand.vmem [shape: bf16[784,128], index: 1, kind: input, shape index: {}]   ;;  %s1249_s2 = inlined_call_operand.vmem [shape: f32[1,128], index: 2, kind: input, shape index: {}]   ;;  %s1250_s3 = inlined_call_operand.vmem [shape: bf16[128,10], index: 3, kind: input, shape index: {}]   ;;  %s1251_s4 = inlined_call_operand.vmem [shape: f32[1,10], index: 4, kind: input, shape index: {}]   ;;  %s1252_s5 = inlined_call_operand.hbm [shape: f32[2,10], index: 5, kind: output, shape index: {}]  }
   0x1   :  { %v932_v0 = vld [vmem:[%s1248_s1 + $0x78] sm:$0xff]   ;;  %v936_v4 = vld [vmem:[%s1248_s1 + $0x70] sm:$0xff]   ;;  %v940_v8 = vld [vmem:[%s1248_s1 + $0x68] sm:$0xff]   ;;  %v28_v36 = vunpack.c.l.s4 %v1013_v35  ;;  %vm472_vm1 = vcmask 130048  }
   0x2   :  { %v933_v1 = vld [vmem:[%s1248_s1 + $0x38] sm:$0xff]   ;;  %825 = vmatprep.subr.bf16.mxu0 %v932_v0  ;;  %v937_v5 = vld [vmem:[%s1248_s1 + $0x30] sm:$0xff]   ;;  %v941_v9 = vld [vmem:[%s1248_s1 + $0x28] sm:$0xff]   ;;  %v31_v32 = vshrl.u32 %v30_v27, 7 }
   0x3   :  { %v934_v2 = vld [vmem:[%s1248_s1 + $0xf8] sm:$0xff]   ;;  %826 = vmatpush3.bf16.msra.mxu0 %v933_v1  ;;  %v938_v6 = vld [vmem:[%s1248_s1 + $0xf0] sm:$0xff]   ;;  %v942_v10 = vld [vmem:[%s1248_s1 + $0xe8] sm:$0xff]   ;;  %v29_v38 = vunpack.c.0.s8 %v28_v36 }
   0x4   :  { %v935_v3 = vld [vmem:[%s1248_s1 + $0xb8] sm:$0xff]   ;;  %847 = vmatprep.subr.bf16.mxu1 %v934_v2  ;;  %827 = vmatprep.subr.bf16.mxu0 %v936_v4  ;;  %v939_v7 = vld [vmem:[%s1248_s1 + $0xb0] sm:$0xff]   ;;  %v943_v11 = vld [vmem:[%s1248_s1 + $0xa8] sm:$0xff]  }
   0x5   :  { %848 = vmatpush3.bf16.msra.mxu1 %v935_v3  ;;  %v944_v12 = vld [vmem:[%s1248_s1 + $0x60] sm:$0xff]   ;;  %v948_v16 = vld [vmem:[%s1248_s1 + $0x58] sm:$0xff]   ;;  %v952_v20 = vld [vmem:[%s1248_s1 + $0x50] sm:$0xff]   ;;  %v32_v41 = vsub.s32 %v29_v38, %v31_v32 }
   0x6   :  { %849 = vmatprep.subr.bf16.mxu1 %v938_v6  ;;  %v945_v13 = vld [vmem:[%s1248_s1 + $0x20] sm:$0xff]   ;;  %v949_v17 = vld [vmem:[%s1248_s1 + $0x18] sm:$0xff]   ;;  %v953_v21 = vld [vmem:[%s1248_s1 + $0x10] sm:$0xff]  }
   0x7   :  { %828 = vmatpush3.bf16.msra.mxu0 %v937_v5  ;;  %v946_v14 = vld [vmem:[%s1248_s1 + $0xe0] sm:$0xff]   ;;  %v950_v18 = vld [vmem:[%s1248_s1 + $0xd8] sm:$0xff]   ;;  %v954_v22 = vld [vmem:[%s1248_s1 + $0xd0] sm:$0xff]  }
   0x8   :  { %829 = vmatprep.subr.bf16.mxu0 %v940_v8  ;;  %v947_v15 = vld [vmem:[%s1248_s1 + $0xa0] sm:$0xff]   ;;  %v951_v19 = vld [vmem:[%s1248_s1 + $0x98] sm:$0xff]   ;;  %v955_v23 = vld [vmem:[%s1248_s1 + $0x90] sm:$0xff]  }
   0x9   :  { %850 = vmatpush3.bf16.msra.mxu1 %v939_v7  ;;  %v956_v24 = vld [vmem:[%s1248_s1 + $0x48] sm:$0xff]   ;;  %v960_v29 = vld [vmem:[%s1248_s1 + $0x40] sm:$0xff]   ;;  %v964_v37 = vld [vmem:[%s1248_s1 + $0x178] sm:$0xff]  }
   0xa   :  { %851 = vmatprep.subr.bf16.mxu1 %v942_v10  ;;  %v957_v25 = vld [vmem:[%s1248_s1 + $0x8] sm:$0xff]   ;;  %v961_v30 = vld [vmem:[%s1248_s1] sm:$0xff]   ;;  %v966_v50 = vld [vmem:[%s1248_s1 + $0x138] sm:$0xff]  }
   0xb   :  { %830 = vmatpush3.bf16.msra.mxu0 %v941_v9  ;;  %v958_v26 = vld [vmem:[%s1248_s1 + $0xc8] sm:$0xff]   ;;  %v962_v31 = vld [vmem:[%s1248_s1 + $0xc0] sm:$0xff]   ;;  %v967_v51 = vld [vmem:[%s1248_s1 + $0x170] sm:$0xff]  }
   0xc   :  { %831 = vmatprep.subr.bf16.mxu0 %v944_v12  ;;  %v959_v28 = vld [vmem:[%s1248_s1 + $0x88] sm:$0xff]   ;;  %v22_v33 = vld [vmem:[%s1247_s0] sm:$0xff]  ;;  %v968_v52 = vld [vmem:[%s1248_s1 + $0x130] sm:$0xff]  }
   0xd   :  { %852 = vmatpush3.bf16.msra.mxu1 %v943_v11  ;;  %v963_v34 = vld [vmem:[%s1248_s1 + $0x80] sm:$0xff]   ;;  %v26_v39 = vcombine.high %v22_v33, %v22_v33  ;;  %v33_v42 = vrot.slane %v22_v33, %v32_v41  ;;  %v969_v53 = vld [vmem:[%s1248_s1 + $0x168] sm:$0xff]   ;;  %v973_v1 = vld [vmem:[%s1248_s1 + $0x158] sm:$0xff]  }
   0xe   :  { %853 = vmatprep.subr.bf16.mxu1 %v946_v14  ;;  %v970_v54 = vld [vmem:[%s1248_s1 + $0x128] sm:$0xff]   ;;  %v971_v55 = vld [vmem:[%s1248_s1 + $0x160] sm:$0xff]  }
   0xf   :  { %832 = vmatpush3.bf16.msra.mxu0 %v945_v13  ;;  %v40_v43 = vrot.slane %v26_v39, %v32_v41  ;;  %v41_v44 = vcombine.high %v33_v42, %v33_v42  ;;  %v66_v46 = vpack.c.bf16 %v33_v42, %v33_v42  ;;  %v981_v56 = vld [vmem:[%s1248_s1 + $0x180] sm:$0xff]   ;;  %v23_v57 = vld [vmem:[%s1247_s0 + $0x8] sm:$0x3f] }
  0x10   :  { %833 = vmatprep.subr.bf16.mxu0 %v948_v16  ;;  %v43_v58 = vcombine.high %v23_v57, %v23_v57  ;;  %v50_v59 = vrot.slane %v23_v57, %v32_v41  ;;  %v972_v60 = vld [vmem:[%s1248_s1 + $0x120] sm:$0xff]  }
  0x11   :  { %854 = vmatpush3.bf16.msra.mxu1 %v947_v15  ;;  %v42_v45 = vcombine.high %v40_v43, %v40_v43  ;;  %v68_v47 = vpack.c.bf16 %v40_v43, %v40_v43  ;;  %v67_v48 = vpack.c.bf16 %v41_v44, %v41_v44 }
  0x12   :  { %855 = vmatprep.subr.bf16.mxu1 %v950_v18  ;;  %v57_v61 = vrot.slane %v43_v58, %v32_v41  ;;  %v58_v62 = vcombine.high %v50_v59, %v50_v59 }
  0x13   :  { %834 = vmatpush3.bf16.msra.mxu0 %v949_v17  ;;  %v69_v49 = vpack.c.bf16 %v42_v45, %v42_v45  ;;  %508 = vmatprep.mubr.bf16.mxu0 %v67_v48 }
  0x14   :  { %835 = vmatprep.subr.bf16.mxu0 %v952_v20  ;;  %v71_v63 = vpack.c.bf16 %v58_v62, %v58_v62  ;;  %v72_v0 = vpack.c.bf16 %v57_v61, %v57_v61 }
  0x15   :  { %856 = vmatpush3.bf16.msra.mxu1 %v951_v19  ;;  %548 = vmatprep.mubr.bf16.mxu1 %v69_v49 }
  0x16   :  { %857 = vmatprep.subr.bf16.mxu1 %v954_v22 }
  0x17   :  { %836 = vmatpush3.bf16.msra.mxu0 %v953_v21 }
  0x18   :  { %837 = vmatprep.subr.bf16.mxu0 %v956_v24 }
  0x19   :  { %858 = vmatpush3.bf16.msra.mxu1 %v955_v23 }
  0x1a   :  { %859 = vmatprep.subr.bf16.mxu1 %v958_v26 }
  0x1b   :  { %838 = vmatpush3.bf16.msra.mxu0 %v957_v25 }
  0x1c   :  { %839 = vmatprep.subr.bf16.mxu0 %v960_v29 }
  0x1d   :  { %860 = vmatpush3.bf16.msra.mxu1 %v959_v28 }
  0x1e   :  { %861 = vmatprep.subr.bf16.mxu1 %v962_v31 }
  0x1f   :  { %840 = vmatpush3.bf16.msra.mxu0 %v961_v30 }
  0x20   :  { %869 = vmatprep.subr.bf16.mxu0 %v964_v37 }
  0x21   :  { %862 = vmatpush3.bf16.msra.mxu1 %v963_v34 }
  0x22   :  { %902 = vmatprep.subr.bf16.mxu1 %v1014_v40  ;;  %509 = vmatmul.mubr.bf16.vlgmr.msra.gmra.mxu0 %v66_v46 }
  0x23   :  { %870 = vmatpush3.bf16.msra.mxu0 %v966_v50 }
  0x24   :  { %549 = vmatmul.mubr.bf16.vlgmr.msra.gmra.mxu1 %v68_v47  ;;  %871 = vmatprep.subr.bf16.mxu0 %v967_v51 }
  0x25   :  { %904 = vmatprep.mubr.msk.bf16.mxu1 %vm1015_vm0, %v1014_v40  ;;  %903 = vmatpush3.bf16.msra.mxu1 %v981_v56 }
  0x26   :  { %908 = vmatprep.subr.bf16.mxu1 %v1014_v40 }
  0x27   :  { %872 = vmatpush3.bf16.msra.mxu0 %v968_v52 }
  0x28   :  { %873 = vmatprep.subr.bf16.mxu0 %v969_v53 }
  0x2b   :  { %874 = vmatpush3.bf16.msra.mxu0 %v970_v54 }
  0x2c   :  { %875 = vmatprep.subr.bf16.mxu0 %v971_v55 }
  0x2d   :  { %10 = vsyncpa [#allocation3], 0  ;;  %588 = vmatprep.mubr.bf16.mxu0 %v71_v63  ;;  %905 = vmatmul.mubr.msk.bf16.vlgmr.msra.gmra.mxu1 %vm472_vm1, %v72_v0  ;;  %v974_v2 = vld [vmem:[%s1248_s1 + $0x118] sm:$0xff]   ;;  %v975_v3 = vld [vmem:[%s1248_s1 + $0x150] sm:$0xff]   ;;  %v70_v9 = vpack.c.bf16 %v50_v59, %v50_v59  ;;  %s1016_s11 = smov [#allocation2]   ;;  %vm749_vm2 = vcmask 74752  }
  0x2e   :  { %924 = vmatprep.mubr.msk.bf16.mxu1 %vm1015_vm0, %v1014_v40  ;;  %v976_v4 = vld [vmem:[%s1248_s1 + $0x110] sm:$0xff]   ;;  %v977_v5 = vld [vmem:[%s1248_s1 + $0x148] sm:$0xff]   ;;  %v979_v7 = vld [vmem:[%s1248_s1 + $0x140] sm:$0xff]   ;;  %s757_s12 = sshll.u32 %s1016_s11, 4  ;;  %s758_s12 = int_to_ptr.vmem [resolvable:$true] %s757_s12 }
  0x2f   :  { %876 = vmatpush3.bf16.msra.mxu0 %v972_v60  ;;  %v978_v6 = vld [vmem:[%s1248_s1 + $0x108] sm:$0xff]   ;;  %v980_v8 = vld [vmem:[%s1248_s1 + $0x100] sm:$0xff]   ;;  %v983_v10 = vld [vmem:[%s1250_s3 + $0x38] sm:$0xff]   ;;  %p996_p1 = scmp.lt.s32.totalorder %s758_s12, %s758_s12 }
  0x30   :  { %877 = vmatprep.subr.bf16.mxu0 %v973_v1  ;;  %909 = vmatpush3.bf16.msra.mxu1 %v983_v10  ;;  %v984_v11 = vld [vmem:[%s1250_s3 + $0x30] sm:$0xff]   ;;  %v985_v12 = vld [vmem:[%s1250_s3 + $0x28] sm:$0xff]   ;;  %v986_v13 = vld [vmem:[%s1250_s3 + $0x20] sm:$0xff]  }
  0x31   :  { %910 = vmatprep.subr.bf16.mxu1 %v1014_v40  ;;  %v987_v14 = vld [vmem:[%s1250_s3 + $0x18] sm:$0xff]   ;;  %v988_v15 = vld [vmem:[%s1250_s3 + $0x10] sm:$0xff]   ;;  %v989_v16 = vld [vmem:[%s1250_s3 + $0x8] sm:$0xff]  }
  0x32   :  { %v990_v17 = vld [vmem:[%s1250_s3] sm:$0xff]  }
  0x33   :  { %878 = vmatpush3.bf16.msra.mxu0 %v974_v2  ;;  %v765_v31 = vld [vmem:[%s1249_s2] ss:$0 sm:$0xff]  ;;  %s991_s2 = scalar_lea.vmem %s758_s12, 32 }
  0x34   :  { %879 = vmatprep.subr.bf16.mxu0 %v975_v3  ;;  %911 = vmatpush3.bf16.msra.mxu1 %v984_v11  ;;  %v816_v44 = vld [vmem:[%s1251_s4] ss:$0 sm:$0xff]  ;;  %p992_p0 = scmp.ne.s32.totalorder %s758_s12, %s991_s2  ;;  %p997_p2 = scmp.lt.s32.totalorder %s991_s2, %s991_s2 }
  0x35   :  { %912 = vmatprep.subr.bf16.mxu1 %v1014_v40 }
  0x36   :  { %p998_p3 = por %p997_p2, %p996_p1 }
  0x37   :  { %880 = vmatpush3.bf16.msra.mxu0 %v976_v4 }
  0x38   :  { %881 = vmatprep.subr.bf16.mxu0 %v977_v5  ;;  %913 = vmatpush3.bf16.msra.mxu1 %v985_v12  ;;  %p999_p4 = pnand %p998_p3, %p992_p0 }
  0x39   :  { %914 = vmatprep.subr.bf16.mxu1 %v1014_v40 }
  0x3b   :  { %882 = vmatpush3.bf16.msra.mxu0 %v978_v6 }
  0x3c   :  { %883 = vmatprep.subr.bf16.mxu0 %v979_v7  ;;  %915 = vmatpush3.bf16.msra.mxu1 %v986_v13 }
  0x3d   :  { %916 = vmatprep.subr.bf16.mxu1 %v1014_v40 }
  0x3f   :  { %884 = vmatpush3.bf16.msra.mxu0 %v980_v8 }
  0x40   :  { %917 = vmatpush3.bf16.msra.mxu1 %v987_v14 }
  0x41   :  { %918 = vmatprep.subr.bf16.mxu1 %v1014_v40 }
  0x42   :  { %589 = vmatmul.mubr.bf16.vlgmr.msra.gmra.mxu0 %v70_v9 }
  0x44   :  { %919 = vmatpush3.bf16.msra.mxu1 %v988_v15 }
  0x45   :  { %920 = vmatprep.subr.bf16.mxu1 %v1014_v40 }
  0x48   :  { %921 = vmatpush3.bf16.msra.mxu1 %v989_v16 }
  0x49   :  { %922 = vmatprep.subr.bf16.mxu1 %v1014_v40 }
  0x4c   :  { %923 = vmatpush3.bf16.msra.mxu1 %v990_v17 }
  0xe2   :  { %v841_v18 = vpop.f32.mrf.mxu0 }
  0xe4   :  { %v863_v19 = vpop.f32.mrf.mxu1  ;;  %v842_v20 = vpop.f32.mrf.mxu0 }
  0xe5   :  { %v843_v30 = vadd.f32 %v842_v20, %v841_v18 }
  0xe6   :  { %v864_v21 = vpop.f32.mrf.mxu1  ;;  %v844_v22 = vpop.f32.mrf.mxu0 }
  0xe7   :  { %v511_v32 = vadd.f32 %v843_v30, %v765_v31  ;;  %v865_v33 = vadd.f32 %v864_v21, %v863_v19 }
  0xe8   :  { %v866_v23 = vpop.f32.mrf.mxu1  ;;  %v845_v24 = vpop.f32.mrf.mxu0 }
  0xe9   :  { %v551_v36 = vadd.f32 %v865_v33, %v511_v32 }
  0xea   :  { %v867_v25 = vpop.f32.mrf.mxu1 }
  0xed   :  { %v630_v26 = vpop.f32.mrf.mxu1 }
  0xef   :  { %v906_v27 = vpop.f32.mrf.mxu1 }
  0xf1   :  { %v633_v28 = vpop.f32.mrf.mxu1 }
  0xf3   :  { %v907_v29 = vpop.f32.mrf.mxu1 }
 0x102   :  { %v885_v34 = vpop.f32.mrf.mxu0 }
 0x104   :  { %v886_v35 = vpop.f32.mrf.mxu0 }
 0x105   :  { %v887_v37 = vadd.f32 %v886_v35, %v885_v34 }
 0x106   :  { %v888_v38 = vpop.f32.mrf.mxu0 }
 0x107   :  { %v591_v39 = vadd.f32 %v887_v37, %v551_v36 }
 0x108   :  { %v889_v40 = vpop.f32.mrf.mxu0 }
 0x109   :  { %v631_v41 = vadd.f32 %v630_v26, %v591_v39 }
 0x10b   :  { %v636_v42 = vmax.f32 %v631_v41, 0.0 }
 0x10d   :  { %v637_v43 = vpack.c.bf16 %v636_v42, %v636_v42 }
 0x10f   :  { %925 = vmatmul.mubr.bf16.vlgmr.msra.gmra.mxu1 %v637_v43 }
 0x1cf   :  { %v743_v45 = vpop.f32.mrf.mxu1 }
 0x1d0   :  { %v744_v46 = vadd.f32 %v816_v44, %v743_v45 }
 0x1d1   :  { %v926_v47 = vpop.f32.mrf.mxu1 }
 0x1d2   :  { %750 = vst.msk [vmem:[#allocation2] sm:$0x3] %vm749_vm2, %v744_v46 }
 0x1d3   :  { %v746_v48 = vpop.f32.mrf.mxu1 }
 0x1d4   :  { %1002 = shalt.err (!%p999_p4)
}
 0x1d5   :  { %760 = dma.vmem_to_hbm [thread:$0]  %s758_s12, 32, %s1252_s5, [#allocation3]   ;;  %v927_v49 = vpop.f32.mrf.mxu1 }
 0x1d6   :  { %1011 = dma.done.wait [#allocation3], 32  }
 0x1d7   :  { %1012 = vsyncadd [#allocation3], 4294967264 }
 0x1d8   :  { %764 = vsyncpa [#allocation3], 1 }

</bundles_post_ra>
